<compile_context>
chip_gen: v7x
topology: tpu7x:2x2x1
jax: 0.10.0
libtpu: 0.0.40
codegen_flags: <defaults>
</compile_context>

<pallas_src>
import functools

import jax
import jax.numpy as jnp
from jax import lax
from jax.experimental import pallas as pl
from jax.experimental.pallas import tpu as pltpu


def _round_up(x, m):
    return (x + m - 1) // m * m


def _proto_sim_kernel(scaler_ref, test_ref, support_ref, targets_ref, label_ref,
                      sim_ref, proto_ref, *, support_size, d_count):
    # Per-grid-step blocks (bb batch items per step):
    #   test_ref    (bb, S, Lt, D)  bf16  (padded D columns are zero)
    #   support_ref (bb, K,  D)     bf16  (column d_count == 1.0; K = S*Ls)
    #   targets_ref (bb, T,  K)     bf16  pre-transposed, lane dim = K
    #   label_ref   (bb, T,  D)     bf16  zero pad-tag row already prepended
    #   sim_ref     (bb, Lt, T)     f32   (T is small -> masked store, tiny)
    #   proto_ref   (bb, T,  D)     f32
    scaler = scaler_ref[0]                              # SMEM scalar (f32)

    tgt = targets_ref[...]                              # (bb, T, K) bf16
    sup = support_ref[...]                              # (bb, K, D) bf16

    # sum_reps[b,t,d] = sum_k targets[b,t,k] * support[b,k,d]  (MXU, f32 acc).
    # Column d_count of support is all-ones, so sum_reps[:,:,d_count] is the
    # per-tag count -- computed for free by the MXU in the padded region.
    sum_reps = lax.dot_general(
        tgt, sup,
        dimension_numbers=(((2,), (1,)), ((0,), (0,))),
        preferred_element_type=jnp.float32)             # (bb, T, D)

    tag_count = sum_reps[:, :, d_count:d_count + 1]     # (bb, T, 1) f32
    # Padded T rows: count==0 -> inv_count ~ 1e4 times a zero sum -> 0 (no NaN).
    inv_count = pl.reciprocal(tag_count + 1e-4, approx=True)

    # proto = (1 - scaler) * (sum_reps / count) + scaler * label
    proto = ((1.0 - scaler) * (sum_reps * inv_count)
             + scaler * label_ref[...].astype(jnp.float32))   # (bb, T, D) f32

    # Mean over the support axis: accumulate one (Lt, D) slab at a time in f32
    # (no full-block f32 temporary); the 1/S is folded into the final scale.
    test_sum = test_ref[:, 0].astype(jnp.float32)       # (bb, Lt, D)
    for s in range(1, support_size):
        test_sum = test_sum + test_ref[:, s].astype(jnp.float32)

    # sim[b,l,t] = mean_s(test)[b,l,:] . proto[b,t,:]
    # Explicit bf16 operands -> single-pass MXU issue with f32 accumulation.
    # proto's extra "count" column contributes nothing because test's padded
    # D columns are zero.
    sim = lax.dot_general(
        test_sum.astype(jnp.bfloat16), proto.astype(jnp.bfloat16),
        dimension_numbers=(((2,), (2,)), ((0,), (0,))),
        preferred_element_type=jnp.float32) * (1.0 / support_size)  # (bb,Lt,T)

    sim_ref[...] = sim
    proto_ref[...] = proto


def proto_with_label_similarity(test_reps, support_reps, support_targets,
                                label_reps, scaler,
                                test_output_mask=None,
                                support_output_mask=None,
                                compute_dtype=jnp.bfloat16):
    """Pallas implementation of ProtoWithLabelSimilarityScorer.forward.

    Returns (sim_score, prototype_reps) just like the PyTorch module.
    test_output_mask / support_output_mask are accepted for signature parity
    but are not used by this scorer's math.
    """
    B, S, Lt, D = test_reps.shape
    Ls = support_reps.shape[2]
    T = support_targets.shape[-1]
    K = S * Ls

    # Padded sizes.  D gets at least one spare column to host the all-ones
    # "count" column; T/Lt only need sublane alignment (16 covers bf16 packing
    # and f32's 8), K stays lane-aligned for the MXU contraction.
    D_p = _round_up(D + 1, 128)
    K_p = _round_up(K, 128)
    T_p = _round_up(T, 16)
    Lt_p = _round_up(Lt, 16)

    in_itemsize = jnp.dtype(compute_dtype).itemsize
    item_bytes = ((S * Lt_p * D_p + K_p * D_p + T_p * K_p + T_p * D_p)
                  * in_itemsize
                  + (Lt_p * T_p + T_p * D_p) * 4)

    # Generation-aware batch blocking.
    try:
        vmem_cap = int(getattr(pltpu.get_tpu_info(), "vmem_capacity_bytes",
                               64 * 2 ** 20))
    except Exception:  # pragma: no cover - conservative fallback off-TPU
        vmem_cap = 64 * 2 ** 20
    vmem_cap = max(vmem_cap, 32 * 2 ** 20)

    # v7x reports ~64 MiB per TensorCore and has 2 TCs: keep >= 2 grid steps so
    # the "parallel" batch axis feeds both cores and per-step footprint stays
    # modest.  v5e/v6e (128 MiB, single TC) take the largest block that fits.
    small_vmem_multicore = vmem_cap < 100 * 2 ** 20
    budget = max(4 * 2 ** 20, vmem_cap // 4)            # per-step block budget

    bb = max(1, min(B, budget // max(item_bytes, 1)))
    if small_vmem_multicore and B >= 2:
        bb = min(bb, (B + 1) // 2)
    bb = int(bb)
    B_p = _round_up(B, bb)

    def pad_to(x, shape):
        return jnp.pad(x, [(0, t - s) for s, t in zip(x.shape, shape)])

    # Host-side relayout (cast to bf16 *before* padding so the pad pass moves
    # half the bytes; all padding is zero-fill so padded rows/cols are inert):
    #   - append the all-ones count column to the flattened support reps
    #   - transpose targets to (B, T, K) so the contraction dim K is lane-dense
    #   - prepend the zero pad-tag row to the label reps.
    test_p = pad_to(test_reps.astype(compute_dtype), (B_p, S, Lt_p, D_p))

    sup_flat = jnp.concatenate(
        [support_reps.reshape(B, K, D).astype(compute_dtype),
         jnp.ones((B, K, 1), dtype=compute_dtype)], axis=-1)     # (B, K, D+1)
    sup_p = pad_to(sup_flat, (B_p, K_p, D_p))

    tgt_p = pad_to(
        jnp.swapaxes(support_targets.reshape(B, K, T), 1, 2).astype(compute_dtype),
        (B_p, T_p, K_p))

    label_full = jnp.concatenate(
        [jnp.zeros((B, 1, D), dtype=label_reps.dtype), label_reps], axis=1)
    lbl_p = pad_to(label_full.astype(compute_dtype), (B_p, T_p, D_p))

    scaler_arr = jnp.asarray([scaler], dtype=jnp.float32)

    step_bytes = bb * item_bytes
    vmem_limit = int(min(max(32 * 2 ** 20, 3 * step_bytes),
                         vmem_cap * 3 // 4))

    kernel = functools.partial(_proto_sim_kernel, support_size=S, d_count=D)

    sim_p, proto_p = pl.pallas_call(
        kernel,
        out_shape=(jax.ShapeDtypeStruct((B_p, Lt_p, T_p), jnp.float32),
                   jax.ShapeDtypeStruct((B_p, T_p, D_p), jnp.float32)),
        grid_spec=pltpu.PrefetchScalarGridSpec(
            num_scalar_prefetch=1,               # scaler lives in SMEM
            grid=(B_p // bb,),
            in_specs=[
                pl.BlockSpec((bb, S, Lt_p, D_p), lambda b, sc: (b, 0, 0, 0)),
                pl.BlockSpec((bb, K_p, D_p), lambda b, sc: (b, 0, 0)),
                pl.BlockSpec((bb, T_p, K_p), lambda b, sc: (b, 0, 0)),
                pl.BlockSpec((bb, T_p, D_p), lambda b, sc: (b, 0, 0)),
            ],
            out_specs=[
                pl.BlockSpec((bb, Lt_p, T_p), lambda b, sc: (b, 0, 0)),
                pl.BlockSpec((bb, T_p, D_p), lambda b, sc: (b, 0, 0)),
            ],
        ),
        compiler_params=pltpu.CompilerParams(
            dimension_semantics=("parallel",),
            vmem_limit_bytes=vmem_limit),
    )(scaler_arr, test_p, sup_p, tgt_p, lbl_p)

    # Strip the zero padding (also drops the "count" column at index D).
    return sim_p[:B, :Lt, :T], proto_p[:B, :T, :D]


def _reference(test_reps, support_reps, support_targets, label_reps, scaler):
    """Plain-JAX reference mirroring the PyTorch forward (f32 math)."""
    st = support_targets.astype(jnp.float32)
    sum_reps = jnp.einsum('bslt,bsld->btd', st, support_reps.astype(jnp.float32))
    tag_count = jnp.sum(st, axis=(1, 2))[..., None] + 1e-4
    proto = sum_reps / tag_count
    label_full = jnp.concatenate(
        [jnp.zeros_like(label_reps[:, :1]), label_reps],
        axis=1).astype(jnp.float32)
    proto = (1.0 - scaler) * proto + scaler * label_full
    test_mean = jnp.mean(test_reps.astype(jnp.float32), axis=1)
    sim = jnp.einsum('bld,btd->blt', test_mean, proto)
    return sim, proto


if __name__ == "__main__":
    key = jax.random.PRNGKey(0)
    B, S, Lt, Ls, D, T = 2, 2, 8, 8, 32, 5
    scaler = 0.3

    k1, k2, k3, k4 = jax.random.split(key, 4)
    test_reps = jax.random.normal(k1, (B, S, Lt, D), dtype=jnp.float32)
    support_reps = jax.random.normal(k2, (B, S, Ls, D), dtype=jnp.float32)
    # One-hot support targets over T tags.
    tag_ids = jax.random.randint(k3, (B, S, Ls), 0, T)
    support_targets = jax.nn.one_hot(tag_ids, T, dtype=jnp.float32)
    # label_reps has T-1 rows (zero row for the pad tag is prepended inside).
    label_reps = jax.random.normal(k4, (B, T - 1, D), dtype=jnp.float32)

    sim, proto = proto_with_label_similarity(
        test_reps, support_reps, support_targets, label_reps, scaler)
    jax.block_until_ready((sim, proto))

    # Reference on bf16-rounded inputs (the kernel's compute dtype); remaining
    # differences are f32-accumulation order, the approx reciprocal (~1e-3
    # rel) and the explicit bf16 sim-matmul operands -- all << tolerance.
    rd = lambda x: x.astype(jnp.bfloat16).astype(jnp.float32)
    sim_ref, proto_ref = _reference(rd(test_reps), rd(support_reps),
                                    support_targets, rd(label_reps), scaler)

    assert sim.shape == (B, Lt, T) and proto.shape == (B, T, D)
    assert jnp.allclose(sim, sim_ref, atol=2e-2, rtol=2e-2), \
        float(jnp.max(jnp.abs(sim - sim_ref)))
    assert jnp.allclose(proto, proto_ref, atol=2e-2, rtol=2e-2), \
        float(jnp.max(jnp.abs(proto - proto_ref)))

    print("KERNEL_OK")
</pallas_src>

<mosaic_0001>
module attributes {stable_mosaic.version = 11 : i64} {
  func.func @_proto_sim_kernel(%arg0: i32, %arg1: memref<1xf32, #tpu.memory_space<smem>>, %arg2: memref<1x2x16x128xbf16, #tpu.memory_space<vmem>>, %arg3: memref<1x128x128xbf16, #tpu.memory_space<vmem>>, %arg4: memref<1x16x128xbf16, #tpu.memory_space<vmem>>, %arg5: memref<1x16x128xbf16, #tpu.memory_space<vmem>>, %arg6: memref<1x16x16xf32, #tpu.memory_space<vmem>>, %arg7: memref<1x16x128xf32, #tpu.memory_space<vmem>>) attributes {dimension_semantics = [#tpu.dimension_semantics<parallel>], iteration_bounds = array<i64: 2>, scalar_prefetch = 1 : i64, scratch_operands = 0 : i64, tpu.core_type = #tpu.core_type<tc>, window_params = [{transform_indices = @transform_0, window_bounds = array<i64: 1, 2, 16, 128>}, {transform_indices = @transform_1, window_bounds = array<i64: 1, 128, 128>}, {transform_indices = @transform_2, window_bounds = array<i64: 1, 16, 128>}, {transform_indices = @transform_3, window_bounds = array<i64: 1, 16, 128>}, {transform_indices = @transform_4, window_bounds = array<i64: 1, 16, 16>}, {transform_indices = @transform_5, window_bounds = array<i64: 1, 16, 128>}]} {
    %c0 = arith.constant 0 : index
    %0 = memref.load %arg1[%c0] : memref<1xf32, #tpu.memory_space<smem>>
    %c0_0 = arith.constant 0 : index
    %c0_1 = arith.constant 0 : index
    %c0_2 = arith.constant 0 : index
    %1 = vector.load %arg4[%c0_0, %c0_1, %c0_2] : memref<1x16x128xbf16, #tpu.memory_space<vmem>>, vector<1x16x128xbf16>
    %c0_3 = arith.constant 0 : index
    %c0_4 = arith.constant 0 : index
    %c0_5 = arith.constant 0 : index
    %2 = vector.load %arg3[%c0_3, %c0_4, %c0_5] : memref<1x128x128xbf16, #tpu.memory_space<vmem>>, vector<1x128x128xbf16>
    %cst = arith.constant dense<0.000000e+00> : vector<1x16x128xf32>
    %3 = tpu.matmul %1, %2, %cst {dimension_numbers = #tpu.dot_dimension_numbers<[2], [1], [1], [2], [0, 0, 0, 1, 1, 2], [0], [0]>} : vector<1x16x128xbf16>, vector<1x128x128xbf16>, vector<1x16x128xf32> -> vector<1x16x128xf32>
    %4 = vector.extract_strided_slice %3 {offsets = [0, 0, 32], sizes = [1, 16, 1], strides = [1, 1, 1]} : vector<1x16x128xf32> to vector<1x16x1xf32>
    %cst_6 = arith.constant 9.99999974E-5 : f32
    %5 = vector.broadcast %cst_6 : f32 to vector<1x16x1xf32>
    %6 = arith.addf %4, %5 : vector<1x16x1xf32>
    %7 = tpu.reciprocal %6 {approx = true} : vector<1x16x1xf32> -> vector<1x16x1xf32>
    %cst_7 = arith.constant 1.000000e+00 : f32
    %8 = arith.subf %cst_7, %0 : f32
    %9 = vector.broadcast %7 : vector<1x16x1xf32> to vector<1x16x128xf32>
    %10 = arith.mulf %3, %9 : vector<1x16x128xf32>
    %11 = vector.broadcast %8 : f32 to vector<1x16x128xf32>
    %12 = arith.mulf %11, %10 : vector<1x16x128xf32>
    %c0_8 = arith.constant 0 : index
    %c0_9 = arith.constant 0 : index
    %c0_10 = arith.constant 0 : index
    %13 = vector.load %arg5[%c0_8, %c0_9, %c0_10] : memref<1x16x128xbf16, #tpu.memory_space<vmem>>, vector<1x16x128xbf16>
    %14 = arith.extf %13 : vector<1x16x128xbf16> to vector<1x16x128xf32>
    %15 = vector.broadcast %0 : f32 to vector<1x16x128xf32>
    %16 = arith.mulf %15, %14 : vector<1x16x128xf32>
    %17 = arith.addf %12, %16 : vector<1x16x128xf32>
    %c0_11 = arith.constant 0 : index
    %c0_12 = arith.constant 0 : index
    %c0_13 = arith.constant 0 : index
    %c0_14 = arith.constant 0 : index
    %18 = vector.load %arg2[%c0_11, %c0_12, %c0_13, %c0_14] : memref<1x2x16x128xbf16, #tpu.memory_space<vmem>>, vector<1x1x16x128xbf16>
    %19 = vector.shape_cast %18 : vector<1x1x16x128xbf16> to vector<1x16x128xbf16>
    %20 = arith.extf %19 : vector<1x16x128xbf16> to vector<1x16x128xf32>
    %c0_15 = arith.constant 0 : index
    %c1 = arith.constant 1 : index
    %c0_16 = arith.constant 0 : index
    %c0_17 = arith.constant 0 : index
    %21 = vector.load %arg2[%c0_15, %c1, %c0_16, %c0_17] : memref<1x2x16x128xbf16, #tpu.memory_space<vmem>>, vector<1x1x16x128xbf16>
    %22 = vector.shape_cast %21 : vector<1x1x16x128xbf16> to vector<1x16x128xbf16>
    %23 = arith.extf %22 : vector<1x16x128xbf16> to vector<1x16x128xf32>
    %24 = arith.addf %20, %23 : vector<1x16x128xf32>
    %25 = arith.truncf %24 : vector<1x16x128xf32> to vector<1x16x128xbf16>
    %26 = arith.truncf %17 : vector<1x16x128xf32> to vector<1x16x128xbf16>
    %cst_18 = arith.constant dense<0.000000e+00> : vector<1x16x16xf32>
    %27 = tpu.matmul %25, %26, %cst_18 {dimension_numbers = #tpu.dot_dimension_numbers<[2], [2], [1], [1], [0, 0, 0, 1, 1, 1], [0], [0]>} : vector<1x16x128xbf16>, vector<1x16x128xbf16>, vector<1x16x16xf32> -> vector<1x16x16xf32>
    %cst_19 = arith.constant 5.000000e-01 : f32
    %28 = vector.broadcast %cst_19 : f32 to vector<1x16x16xf32>
    %29 = arith.mulf %27, %28 : vector<1x16x16xf32>
    %c0_20 = arith.constant 0 : index
    %c0_21 = arith.constant 0 : index
    %c0_22 = arith.constant 0 : index
    %30 = vector.load %arg6[%c0_20, %c0_21, %c0_22] : memref<1x16x16xf32, #tpu.memory_space<vmem>>, vector<1x16x16xf32>
    tpu.vector_store %arg6[%c0_20, %c0_21, %c0_22], %29 {strides = array<i32>} : memref<1x16x16xf32, #tpu.memory_space<vmem>>, vector<1x16x16xf32>,
    %c0_23 = arith.constant 0 : index
    %c0_24 = arith.constant 0 : index
    %c0_25 = arith.constant 0 : index
    %31 = vector.load %arg7[%c0_23, %c0_24, %c0_25] : memref<1x16x128xf32, #tpu.memory_space<vmem>>, vector<1x16x128xf32>
    tpu.vector_store %arg7[%c0_23, %c0_24, %c0_25], %17 {strides = array<i32>} : memref<1x16x128xf32, #tpu.memory_space<vmem>>, vector<1x16x128xf32>,
    return
  }
  func.func @transform_0(%arg0: i32, %arg1: memref<1xf32, #tpu.memory_space<smem>>) -> (i32, i32, i32, i32) {
    %c0_i32 = arith.constant 0 : i32
    %c0_i32_0 = arith.constant 0 : i32
    %c0_i32_1 = arith.constant 0 : i32
    %c0_i32_2 = arith.constant 0 : i32
    return %arg0, %c0_i32, %c0_i32_0, %c0_i32_1 : i32, i32, i32, i32
  }
  func.func @transform_1(%arg0: i32, %arg1: memref<1xf32, #tpu.memory_space<smem>>) -> (i32, i32, i32) {
    %c0_i32 = arith.constant 0 : i32
    %c0_i32_0 = arith.constant 0 : i32
    %c0_i32_1 = arith.constant 0 : i32
    return %arg0, %c0_i32, %c0_i32_0 : i32, i32, i32
  }
  func.func @transform_2(%arg0: i32, %arg1: memref<1xf32, #tpu.memory_space<smem>>) -> (i32, i32, i32) {
    %c0_i32 = arith.constant 0 : i32
    %c0_i32_0 = arith.constant 0 : i32
    %c0_i32_1 = arith.constant 0 : i32
    return %arg0, %c0_i32, %c0_i32_0 : i32, i32, i32
  }
  func.func @transform_3(%arg0: i32, %arg1: memref<1xf32, #tpu.memory_space<smem>>) -> (i32, i32, i32) {
    %c0_i32 = arith.constant 0 : i32
    %c0_i32_0 = arith.constant 0 : i32
    %c0_i32_1 = arith.constant 0 : i32
    return %arg0, %c0_i32, %c0_i32_0 : i32, i32, i32
  }
  func.func @transform_4(%arg0: i32, %arg1: memref<1xf32, #tpu.memory_space<smem>>) -> (i32, i32, i32) {
    %c0_i32 = arith.constant 0 : i32
    %c0_i32_0 = arith.constant 0 : i32
    %c0_i32_1 = arith.constant 0 : i32
    return %arg0, %c0_i32, %c0_i32_0 : i32, i32, i32
  }
  func.func @transform_5(%arg0: i32, %arg1: memref<1xf32, #tpu.memory_space<smem>>) -> (i32, i32, i32) {
    %c0_i32 = arith.constant 0 : i32
    %c0_i32_0 = arith.constant 0 : i32
    %c0_i32_1 = arith.constant 0 : i32
    return %arg0, %c0_i32, %c0_i32_0 : i32, i32, i32
  }
}

</mosaic_0001>

<bundles_post_ra>
// kernel: tpu_custom_call.1
= control target key start
LH: loop header
LB: loop body
LE: loop exit
PB: predicated region body
PF: predicated region fallthrough
CT: control target
= control target key end

     0   :  { %s1610_s0 = inlined_call_operand.<no memory space> [shape: f32[1], index: 0, kind: input, shape index: {}]   ;;  %s1611_s1 = inlined_call_operand.hbm [shape: bf16[2,2,16,128], index: 1, kind: input, shape index: {}]   ;;  %s1612_s2 = inlined_call_operand.hbm [shape: bf16[2,128,128], index: 2, kind: input, shape index: {}]   ;;  %s1613_s3 = inlined_call_operand.hbm [shape: bf16[2,16,128], index: 3, kind: input, shape index: {}]   ;;  %s1614_s4 = inlined_call_operand.hbm [shape: bf16[2,16,128], index: 4, kind: input, shape index: {}]   ;;  %s1615_s5 = inlined_call_operand.hbm [shape: f32[2,16,16], index: 5, kind: output, shape index: {0}]   ;;  %s1616_s6 = inlined_call_operand.hbm [shape: f32[2,16,128], index: 6, kind: output, shape index: {1}]  }
   0x1   :  { %1623 = sst [smem:[#allocation21_spill]] %s1611_s1 }
   0x2   :  { %1624 = sst [smem:[#allocation22_spill]] %s1612_s2 }
   0x3   :  { %12 = sst [smem:[#allocation3]] %s1610_s0 }
   0x4   :  { %13 = vsyncpa [#allocation5], 0 }
   0x5   :  { %15 = vsyncpa [#allocation5 + $0x1], 0 }
   0x6   :  { %16 = vsyncpa [#allocation8], 0 }
   0x7   :  { %18 = vsyncpa [#allocation8 + $0x1], 0 }
   0x8   :  { %19 = vsyncpa [#allocation11], 0 }
   0x9   :  { %21 = vsyncpa [#allocation11 + $0x1], 0 }
   0xa   :  { %22 = vsyncpa [#allocation6], 0 }
   0xb   :  { %24 = vsyncpa [#allocation6 + $0x1], 0 }
   0xc   :  { %25 = vsyncpa [#allocation14], 0 }
   0xd   :  { %27 = vsyncpa [#allocation14 + $0x1], 0  ;;  %s1247_s23 = smov 0   ;;  %s1249_s24 = smov 0  }
   0xe   :  { %s1251_s25 = smov 0   ;;  %s1253_s26 = smov 0  }
   0xf LB: > { %s1268_s0 = sadd.s32 4294967295, %s1194_s26   ;;  %s784_s27 = sadd.s32 4294967294, %s1194_s26   ;;  %s1194_s26 = sphi %s1253_s26, %s1646_s26   ;;  %s1190_s25 = sphi %s1251_s25, %s1645_s25   ;;  %s1186_s24 = sphi %s1249_s24, %s1644_s24   ;;  %s1182_s23 = sphi %s1247_s23, %s1643_s23  }
  0x10   : > { %s1272_s28 = sadd.s32 1, %s1194_s26   ;;  %s40_s29 = sadd.s32 1, %s1190_s25 }
  0x11   : > { %s37_s30 = ssub.s32 %s1194_s26, %s1272_s28  ;;  %p47_p0 = scmp.ne.s32.totalorder %s1190_s25, %s1186_s24 }
  0x12   : > { %p38_p1 = scmp.eq.s32.totalorder %s37_s30, 0  ;;  %p48_p2 = scmp.eq.s32.totalorder %s1194_s26, 0 }
  0x13   : > { %p53_p3 = scmp.ne.s32.totalorder %s1186_s24, %s1182_s23  ;;  %p54_p4 = scmp.eq.s32.totalorder %s1268_s0, 0 }
  0x14   : > { %s1284_s7 = scalar_select %p38_p1, %s1190_s25, %s40_s29  }
  0x15   : > { %p49_p5 = por %p48_p2, %p47_p0  ;;  %p1286_p6 = por %p54_p4, %p53_p3 }
  0x16   : > { %1625 = sst [smem:[#allocation20_spill]] %s1284_s7  ;;  %p155_p7 = scmp.eq.s32.totalorder %s1268_s0, 1 }
  0x17   : > { %s1626_s8 = scalar_select %p1286_p6, 1, 0 }
  0x18   : > { %p161_p8 = scmp.eq.s32.totalorder %s784_s27, 1  ;;  %p913_p10 = scmp.lt.s32.totalorder %s1194_s26, 2 }
  0x19   : > { %p1293_p11 = por %p155_p7, %p47_p0  ;;  %s1302_s11 = sand.u32 1, %s1190_s25  }
  0x1a   : > { %p1297_p12 = por %p161_p8, %p53_p3  ;;  %p1304_p13 = pnand %p913_p10, %p49_p5 }
  0x1b   : > { %s1627_s9 = scalar_select %p1293_p11, 1, 0 }
  0x1c   : > { %s1628_s10 = scalar_select %p1297_p12, 1, 0 }
  0x1d   : > { %s228_s13 = sand.u32 1, %s1194_s26   ;;  %s790_s14 = sshll.u32 %s1302_s11, 6 }
  0x1e   : > { %s826_s15 = sshll.u32 %s1194_s26, 10  ;;  %s1630_s2 = sld [smem:[#allocation22_spill]] }
  0x1f   : > { %s232_s19 = scalar_lea.vmem [#allocation7], %s790_s14  ;;  %s1319_s21 = scalar_lea.sflag [#allocation8], %s228_s13 }
  0x20   : > { %s239_s20 = sshll.u32 %s232_s19, 4  ;;  %p1325_p2 = pneg %p1304_p13  ;;  %s1316_s20 = int_to_ptr.vmem [resolvable:$true] %s239_s20 }
  0x24   : > { %s1314_s18 = scalar_lea.hbm %s1630_s2, %s826_s15  ;;  %s973_s14 = scalar_lea.hbm %s1630_s2, 2048 }
  0x25   : > { %s968_s22 = scalar_lea.hbm %s1314_s18, 1024  ;;  %p974_p5 = scmp.lt.u32.totalorder %s1314_s18, %s1630_s2 }
  0x26   : > { %p969_p1 = scmp.ne.s32.totalorder %s1314_s18, %s968_s22  ;;  %p975_p7 = scmp.lt.u32.totalorder %s973_s14, %s968_s22 }
  0x27   : > { %p977_p10 = scmp.lt.u32.totalorder %s968_s22, %s1314_s18 }
  0x28   : > { %p971_p3 = pnand %p1325_p2, %p969_p1  ;;  %p976_p8 = por %p975_p7, %p974_p5 }
  0x2a   : > { %p972_p4 = pneg %p971_p3  ;;  %p978_p9 = por %p977_p10, %p976_p8 }
  0x2c   : > { %p979_p0 = pnand %p978_p9, %p972_p4 }
  0x2e   : > { %982 = shalt.err (!%p979_p0)
}
  0x2f   : > { %s983_s13 = scalar_lea.vmem %s1316_s20, 1024  ;;  %s1196_s17 = smov [#allocation7]  }
  0x30   : > { %p984_p1 = scmp.ne.s32.totalorder %s1316_s20, %s983_s13  ;;  %s988_s19 = sshll.u32 %s1196_s17, 4  ;;  %s989_s19 = int_to_ptr.vmem [resolvable:$false] %s988_s19 }
  0x31   : > { %s990_s29 = scalar_lea.vmem %s989_s19, 2048  ;;  %p991_p11 = scmp.lt.s32.totalorder %s1316_s20, %s989_s19 }
  0x32   : > { %p986_p3 = pnand %p984_p1, %p1325_p2  ;;  %p992_p6 = scmp.lt.s32.totalorder %s990_s29, %s983_s13 }
  0x34   : > { %p987_p12 = pneg %p986_p3  ;;  %p993_p5 = por %p992_p6, %p991_p11 }
  0x36   : > { %p994_p7 = pnand %p993_p5, %p987_p12 }
  0x38   : > { %997 = shalt.err (!%p994_p7)
}
  0x39   : > { %s1619_s22 = smov 64   ;;  %s1621_s30 = smov 4  }
  0x3a   : > { %899 = dma.hbm_to_vmem [thread:$0]  (!%p1304_p13), %s1314_s18, 1024, %s1316_s20, %s1319_s21, %s1619_s22, %s1619_s22, %s1621_s30  }
  0x3b   : > { %p289_p6 = scmp.lt.s32.totalorder %s1194_s26, 3  ;;  %s787_s14 = sshll.u32 %s1302_s11, 4 }
  0x3c   : > { %s825_s15 = sshll.u32 %s1194_s26, 8  ;;  %p1632_p9 = scmp.ge.s32.totalorder %s1194_s26, 1 }
  0x3d   : > { %s1634_s1 = sld [smem:[#allocation21_spill]]  ;;  %s211_s29 = scalar_lea.vmem [#allocation4], %s787_s14 }
  0x3e   : > { %p1357_p11 = pnand %p1632_p9, %p289_p6  ;;  %s218_s2 = sshll.u32 %s211_s29, 4  ;;  %s1366_s2 = int_to_ptr.vmem [resolvable:$true] %s218_s2 }
  0x3f   : > { %s793_s18 = sshll.u32 %s1302_s11, 3  ;;  %s208_s20 = scalar_lea.sflag [#allocation5], %s1302_s11 }
  0x40   : > { %s1633_s16 = scalar_select %p1357_p11, 1, 0 }
  0x43   : > { %s1364_s19 = scalar_lea.hbm %s1634_s1, %s825_s15  ;;  %s1003_s15 = scalar_lea.hbm %s1634_s1, 512 }
  0x44   : > { %s998_s22 = scalar_lea.hbm %s1364_s19, 256  ;;  %p1004_p8 = scmp.lt.u32.totalorder %s1364_s19, %s1634_s1 }
  0x45   : > { %p999_p12 = scmp.ne.s32.totalorder %s1364_s19, %s998_s22  ;;  %p1005_p10 = scmp.lt.u32.totalorder %s1003_s15, %s998_s22 }
  0x46   : > { %p1007_p3 = scmp.lt.u32.totalorder %s998_s22, %s1364_s19 }
  0x47   : > { %p1001_p0 = pnand %p999_p12, %p1325_p2  ;;  %p1006_p1 = por %p1005_p10, %p1004_p8 }
  0x49   : > { %p1002_p4 = pneg %p1001_p0  ;;  %p1008_p5 = por %p1007_p3, %p1006_p1 }
  0x4b   : > { %p1009_p7 = pnand %p1008_p5, %p1002_p4 }
  0x4d   : > { %1012 = shalt.err (!%p1009_p7)
}
  0x4e   : > { %s1013_s14 = scalar_lea.vmem %s1366_s2, 256  ;;  %s1199_s7 = smov [#allocation4]  }
  0x4f   : > { %p1014_p6 = scmp.ne.s32.totalorder %s1366_s2, %s1013_s14  ;;  %s1018_s30 = sshll.u32 %s1199_s7, 4  ;;  %s1019_s30 = int_to_ptr.vmem [resolvable:$false] %s1018_s30 }
  0x50   : > { %s1020_s29 = scalar_lea.vmem %s1019_s30, 512  ;;  %p1021_p0 = scmp.lt.s32.totalorder %s1366_s2, %s1019_s30 }
  0x51   : > { %p1016_p9 = pnand %p1014_p6, %p1325_p2  ;;  %p1022_p11 = scmp.lt.s32.totalorder %s1020_s29, %s1013_s14 }
  0x53   : > { %p1017_p12 = pneg %p1016_p9  ;;  %p1023_p8 = por %p1022_p11, %p1021_p0 }
  0x55   : > { %p1024_p10 = pnand %p1023_p8, %p1017_p12 }
  0x57   : > { %1027 = shalt.err (!%p1024_p10)
}
  0x58   : > { %s1635_s22 = smov 4   ;;  %s1636_s15 = smov 64  }
  0x59   : > { %896 = dma.hbm_to_vmem [thread:$0]  (!%p1304_p13), %s1364_s19, 256, %s1366_s2, %s208_s20, %s1636_s15, %s1636_s15, %s1635_s22  }
  0x5a   : > { %s827_s13 = sshll.u32 %s1194_s26, 7  ;;  %s253_s30 = scalar_lea.vmem [#allocation9], %s793_s18 }
  0x5b   : > { %s1402_s7 = scalar_lea.hbm %s1613_s3, %s827_s13  ;;  %s260_s29 = sshll.u32 %s253_s30, 4  ;;  %s1406_s29 = int_to_ptr.vmem [resolvable:$true] %s260_s29 }
  0x5c   : > { %s1028_s1 = scalar_lea.hbm %s1402_s7, 128  ;;  %s1033_s20 = scalar_lea.hbm %s1613_s3, 256 }
  0x5d   : > { %p1029_p11 = scmp.ne.s32.totalorder %s1402_s7, %s1028_s1  ;;  %p1034_p3 = scmp.lt.u32.totalorder %s1402_s7, %s1613_s3 }
  0x5e   : > { %p1035_p5 = scmp.lt.u32.totalorder %s1033_s20, %s1028_s1  ;;  %p1037_p6 = scmp.lt.u32.totalorder %s1028_s1, %s1402_s7 }
  0x5f   : > { %p1031_p4 = pnand %p1029_p11, %p1325_p2 }
  0x60   : > { %p1036_p7 = por %p1035_p5, %p1034_p3 }
  0x61   : > { %p1032_p1 = pneg %p1031_p4 }
  0x62   : > { %p1038_p9 = por %p1037_p6, %p1036_p7 }
  0x64   : > { %p1039_p12 = pnand %p1038_p9, %p1032_p1 }
  0x66   : > { %1042 = shalt.err (!%p1039_p12)
}
  0x67   : > { %s1043_s30 = scalar_lea.vmem %s1406_s29, 128  ;;  %s1200_s2 = smov [#allocation9]  }
  0x68   : > { %p1044_p0 = scmp.ne.s32.totalorder %s1406_s29, %s1043_s30  ;;  %s1048_s19 = sshll.u32 %s1200_s2, 4  ;;  %s1049_s19 = int_to_ptr.vmem [resolvable:$false] %s1048_s19 }
  0x69   : > { %s1050_s17 = scalar_lea.vmem %s1049_s19, 256  ;;  %p1051_p11 = scmp.lt.s32.totalorder %s1406_s29, %s1049_s19 }
  0x6a   : > { %p1046_p8 = pnand %p1044_p0, %p1325_p2  ;;  %p1052_p4 = scmp.lt.s32.totalorder %s1050_s17, %s1043_s30 }
  0x6c   : > { %p1047_p10 = pneg %p1046_p8  ;;  %p1053_p3 = por %p1052_p4, %p1051_p11 }
  0x6e   : > { %p1054_p5 = pnand %p1053_p3, %p1047_p10 }
  0x70   : > { %1057 = shalt.err (!%p1054_p5)
}
  0x71   : > { %902 = dma.hbm_to_vmem [thread:$0]  (!%p1304_p13), %s1402_s7, 128, %s1406_s29, %s1319_s21, %s1636_s15, %s1636_s15, %s1635_s22  }
  0x72   : > { %s1438_s14 = scalar_lea.hbm %s1614_s4, %s827_s13  ;;  %s274_s30 = scalar_lea.vmem [#allocation10], %s793_s18 }
  0x73   : > { %s281_s2 = sshll.u32 %s274_s30, 4  ;;  %s271_s19 = scalar_lea.sflag [#allocation11], %s1302_s11  ;;  %s1442_s2 = int_to_ptr.vmem [resolvable:$true] %s281_s2 }
  0x74   : > { %s1058_s17 = scalar_lea.hbm %s1438_s14, 128  ;;  %s1063_s13 = scalar_lea.hbm %s1614_s4, 256 }
  0x75   : > { %p1059_p1 = scmp.ne.s32.totalorder %s1438_s14, %s1058_s17  ;;  %p1064_p9 = scmp.lt.u32.totalorder %s1438_s14, %s1614_s4 }
  0x76   : > { %p1065_p12 = scmp.lt.u32.totalorder %s1063_s13, %s1058_s17  ;;  %p1067_p8 = scmp.lt.u32.totalorder %s1058_s17, %s1438_s14 }
  0x77   : > { %p1061_p7 = pnand %p1059_p1, %p1325_p2 }
  0x78   : > { %p1066_p0 = por %p1065_p12, %p1064_p9 }
  0x79   : > { %p1062_p6 = pneg %p1061_p7 }
  0x7a   : > { %p1068_p10 = por %p1067_p8, %p1066_p0 }
  0x7c   : > { %p1069_p11 = pnand %p1068_p10, %p1062_p6 }
  0x7e   : > { %1072 = shalt.err (!%p1069_p11)
}
  0x7f   : > { %s1073_s18 = scalar_lea.vmem %s1442_s2, 128  ;;  %s1201_s20 = smov [#allocation10]  }
  0x80   : > { %p1074_p4 = scmp.ne.s32.totalorder %s1442_s2, %s1073_s18  ;;  %s1078_s30 = sshll.u32 %s1201_s20, 4  ;;  %s1079_s30 = int_to_ptr.vmem [resolvable:$false] %s1078_s30 }
  0x81   : > { %s1080_s21 = scalar_lea.vmem %s1079_s30, 256  ;;  %p1081_p1 = scmp.lt.s32.totalorder %s1442_s2, %s1079_s30 }
  0x82   : > { %p1076_p3 = pnand %p1074_p4, %p1325_p2  ;;  %p1082_p7 = scmp.lt.s32.totalorder %s1080_s21, %s1073_s18 }
  0x84   : > { %p1077_p5 = pneg %p1076_p3  ;;  %p1083_p9 = por %p1082_p7, %p1081_p1 }
  0x86   : > { %p1084_p12 = pnand %p1083_p9, %p1077_p5 }
  0x88   : > { %1087 = shalt.err (!%p1084_p12)
}
  0x89   : > { %905 = dma.hbm_to_vmem [thread:$0]  (!%p1304_p13), %s1438_s14, 128, %s1442_s2, %s271_s19, %s1636_s15, %s1636_s15, %s1635_s22  }
  0x8a   : > { %p1637_p2 = scmp.ne.s32.totalorder %s1633_s16, 0 }
  0x8b   : > { %s1474_s27 = sand.u32 (!%p1637_p2), 1, %s1186_s24   ;;  %p1638_p6 = scmp.ne.s32.totalorder (!%p1637_p2), %s1626_s8, 0 }
  0x8c   : > { %293 = sbr.rel (%p1637_p2) target bundleno = 790 (0x316), region = 36  ;;  %s1477_s17 = sshll.u32 (!%p1637_p2), %s1474_s27, 4 }
  0x8d   : > { %s296_s12 = scalar_lea.sflag (!%p1637_p2), [#allocation5], %s1474_s27  ;;  %s299_s7 = scalar_lea.vmem (!%p1637_p2), [#allocation4], %s1477_s17 }
  0x93   : > { %1161 = dma.done.wait (%p1638_p6), %s296_s12, 256  }
  0x94   : > { %1163 = vsyncadd (%p1638_p6), %s296_s12, 4294967040  ;;  %s304_s11 = sand.u32 1, %s1268_s0   ;;  %s801_s16 = sshll.u32 %s1474_s27, 6 }
  0x95   : > { %s305_s22 = scalar_lea.sflag [#allocation8], %s304_s11  ;;  %s1487_s15 = scalar_lea.vmem [#allocation7], %s801_s16 }
  0x96   : > { %1165 = dma.done.wait (%p1638_p6), %s305_s22, 1152  }
  0x97   : > { %1167 = vsyncadd (%p1638_p6), %s305_s22, 4294966144  ;;  %s802_s14 = sshll.u32 %s1474_s27, 3  ;;  %s323_s19 = scalar_lea.sflag [#allocation11], %s1474_s27 }
  0x98   : > { %s1494_s2 = scalar_lea.vmem [#allocation9], %s802_s14  ;;  %s1497_s13 = scalar_lea.vmem [#allocation10], %s802_s14 }
  0x99   : > { %1169 = dma.done.wait (%p1638_p6), %s323_s19, 128  }
  0x9a   : > { %1171 = vsyncadd (%p1638_p6), %s323_s19, 4294967168  ;;  %v1202_v0 = vmov 0.0   ;;  %vm1203_vm0 = vmmov 0   ;;  %v955_v1 = vld [vmem:[%s1487_s15] sm:$0xff]   ;;  %v956_v2 = vld [vmem:[%s1487_s15 + $0x8] sm:$0xff]   ;;  %v1204_v10 = vmov 32  }
  0x9b   : > { %855 = vmatprep.subr.bf16.mxu0 %v1202_v0  ;;  %871 = vmatprep.mubr.msk.bf16.mxu0 %vm1203_vm0, %v1202_v0  ;;  %v957_v3 = vld [vmem:[%s1487_s15 + $0x10] sm:$0xff]   ;;  %v958_v4 = vld [vmem:[%s1487_s15 + $0x18] sm:$0xff]   ;;  %v959_v5 = vld [vmem:[%s1487_s15 + $0x20] sm:$0xff]   ;;  %s374_s8 = sld [smem:[#allocation3]]  ;;  %s372_s1 = scalar_lea.vmem [#allocation13], %s1477_s17 }
  0x9c   : > { %875 = vmatprep.subr.bf16.mxu1 %v1202_v0  ;;  %877 = vmatprep.mubr.msk.bf16.mxu1 %vm1203_vm0, %v1202_v0  ;;  %v960_v6 = vld [vmem:[%s1487_s15 + $0x28] sm:$0xff]   ;;  %v961_v7 = vld [vmem:[%s1487_s15 + $0x30] sm:$0xff]   ;;  %v962_v8 = vld [vmem:[%s1487_s15 + $0x38] sm:$0xff]   ;;  %s613_s18 = sshll.u32 %s372_s1, 4  ;;  %s829_s20 = sshll.u32 %s1268_s0, 8  ;;  %s1519_s18 = int_to_ptr.vmem [resolvable:$true] %s613_s18 }
  0x9d   : > { %856 = vmatpush3.bf16.msra.mxu0 %v955_v1  ;;  %v963_v9 = vld [vmem:[%s1494_s2] sm:$0xff]   ;;  %954 = vset.pattern.permute.xlu0 %v1204_v10  ;;  %v832_v19 = vld [vmem:[%s1497_s13] sm:$0xff]   ;;  %s1526_s12 = scalar_lea.hbm %s1616_s6, %s829_s20  ;;  %s1088_s11 = scalar_lea.vmem %s1519_s18, 256 }
  0x9e   : > { %857 = vmatprep.subr.bf16.mxu0 %v1202_v0  ;;  %v833_v20 = vunpack.c.l.bf16 %v832_v19  ;;  %v834_v25 = vunpack.c.h.bf16 %v832_v19  ;;  %v836_v32 = vld [vmem:[%s299_s7] sm:$0xff]   ;;  %v843_v33 = vld [vmem:[%s299_s7 + $0x8] sm:$0xff]   ;;  %s584_s7 = scalar_lea.sflag [#allocation14], %s1474_s27  ;;  %p1089_p13 = scmp.ne.s32.totalorder %s1519_s18, %s1088_s11 }
  0x9f   : > { %v837_v35 = vunpack.c.l.bf16 %v836_v32  ;;  %v838_v36 = vunpack.c.h.bf16 %v836_v32  ;;  %v841_v37 = vunpack.c.l.bf16 %v843_v33  ;;  %v842_v38 = vunpack.c.h.bf16 %v843_v33  ;;  %p1639_p0 = scmp.ne.s32.totalorder %s1627_s9, 0  ;;  %s1205_s16 = smov [#allocation13]  }
  0xa0   : > { %s1092_s22 = sshll.u32 %s1205_s16, 4  ;;  %s1093_s22 = int_to_ptr.vmem [resolvable:$false] %s1092_s22 }
  0xa1   : > { %858 = vmatpush3.bf16.msra.mxu0 %v956_v2  ;;  %s492_s29 = ssub.f32 1.0, %s374_s8  ;;  %v512_v21 = vstv %s374_s8  ;;  %v526_v41 = vadd.f32 %v841_v37, %v837_v35  ;;  %v527_v42 = vadd.f32 %v842_v38, %v838_v36  ;;  %p1090_p8 = pnand %p1089_p13, %p1639_p0 }
  0xa2   : > { %859 = vmatprep.subr.bf16.mxu0 %v1202_v0  ;;  %v513_v26 = vmul.f32 %v833_v20, %v512_v21  ;;  %v514_v30 = vmul.f32 %v834_v25, %v512_v21  ;;  %s1094_s15 = scalar_lea.vmem %s1093_s22, 512  ;;  %p1095_p11 = scmp.lt.s32.totalorder %s1519_s18, %s1093_s22 }
  0xa3   : > { %v505_v23 = vstv %s492_s29  ;;  %v528_v43 = vpack.c.bf16 %v527_v42, %v526_v41  ;;  %p1091_p10 = pneg %p1090_p8  ;;  %p1096_p4 = scmp.lt.s32.totalorder %s1094_s15, %s1088_s11 }
  0xa5   : > { %860 = vmatpush3.bf16.msra.mxu0 %v957_v3  ;;  %p1097_p3 = por %p1096_p4, %p1095_p11 }
  0xa6   : > { %861 = vmatprep.subr.bf16.mxu0 %v1202_v0 }
  0xa7   : > { %p1098_p5 = pnand %p1097_p3, %p1091_p10 }
  0xa9   : > { %862 = vmatpush3.bf16.msra.mxu0 %v958_v4 }
  0xaa   : > { %863 = vmatprep.subr.bf16.mxu0 %v1202_v0 }
  0xad   : > { %864 = vmatpush3.bf16.msra.mxu0 %v959_v5 }
  0xae   : > { %865 = vmatprep.subr.bf16.mxu0 %v1202_v0 }
  0xb1   : > { %866 = vmatpush3.bf16.msra.mxu0 %v960_v6 }
  0xb2   : > { %867 = vmatprep.subr.bf16.mxu0 %v1202_v0 }
  0xb5   : > { %868 = vmatpush3.bf16.msra.mxu0 %v961_v7 }
  0xb6   : > { %869 = vmatprep.subr.bf16.mxu0 %v1202_v0 }
  0xb9   : > { %870 = vmatpush3.bf16.msra.mxu0 %v962_v8 }
  0xbc   : > { %872 = vmatmul.mubr.bf16.vlgmr.msra.gmra.mrb[0].mxu0 %v963_v9 }
 0x18f   : > { %v481_v11 = vpop.f32.mrb[0].mxu0 }
 0x190   : > { %v488_v12 = vadd.f32 0.0001, %v481_v11  ;;  %v873_v13 = vpop.f32.mrb[1].mxu0 }
 0x191   : > { %v484_v14 = vpop.f32.mrb[2].mxu0 }
 0x192   : > { %964 = vrcp.f32 %v488_v12  ;;  %v489_v15 = vadd.f32 0.0001, %v484_v14  ;;  %v874_v16 = vpop.f32.mrb[3].mxu0 }
 0x194   : > { %966 = vrcp.f32 %v489_v15 }
 0x19c   : > { %v965_v17 = vpop.eup %964 }
 0x19d   : > { %495 = vperm.xlu0 %954, %v965_v17  }
 0x19e   : > { %v967_v18 = vpop.eup %966 }
 0x1a1   : > { %500 = vperm.xlu0 %954, %v967_v18  }
 0x21c   : > { %v496_v22 = vpop.permute.xlu0 %495 }
 0x21d   : > { %v503_v24 = vmul.f32 %v496_v22, %v481_v11 }
 0x21f   : > { %v506_v27 = vmul.f32 %v505_v23, %v503_v24 }
 0x220   : > { %v501_v28 = vpop.permute.xlu0 %500 }
 0x221   : > { %v504_v29 = vmul.f32 %v501_v28, %v484_v14  ;;  %v515_v31 = vadd.f32 %v513_v26, %v506_v27 }
 0x223   : > { %v507_v34 = vmul.f32 %v505_v23, %v504_v29  ;;  %576 = vst [vmem:[%s372_s1] sm:$0xff] %v515_v31 }
 0x225   : > { %v516_v39 = vadd.f32 %v514_v30, %v507_v34 }
 0x227   : > { %v529_v40 = vpack.c.bf16 %v516_v39, %v515_v31  ;;  %577 = vst [vmem:[%s372_s1 + $0x8] sm:$0xff] %v516_v39 }
 0x229   : > { %876 = vmatpush3.bf16.xpose.msra.mxu1 %v529_v40 }
 0x230   : > { %878 = vmatmul.mubr.bf16.vlgmr.msra.gmra.mrb[0].mxu1 %v528_v43 }
 0x231   : > { %1101 = shalt.err (!%p1098_p5)
}
 0x232   : > { %s1102_s14 = scalar_lea.hbm %s1526_s12, 256  ;;  %s1106_s13 = scalar_lea.hbm %s1616_s6, 512 }
 0x233   : > { %p1103_p1 = scmp.ne.s32.totalorder %s1526_s12, %s1102_s14  ;;  %p1107_p12 = scmp.lt.u32.totalorder %s1526_s12, %s1616_s6 }
 0x234   : > { %p1108_p2 = scmp.lt.u32.totalorder %s1106_s13, %s1102_s14  ;;  %p1110_p13 = scmp.lt.u32.totalorder %s1102_s14, %s1526_s12 }
 0x235   : > { %p1104_p7 = pnand %p1103_p1, %p1639_p0 }
 0x236   : > { %p1109_p6 = por %p1108_p2, %p1107_p12 }
 0x237   : > { %p1105_p9 = pneg %p1104_p7 }
 0x238   : > { %p1111_p8 = por %p1110_p13, %p1109_p6 }
 0x23a   : > { %p1112_p10 = pnand %p1111_p8, %p1105_p9 }
 0x23c   : > { %1115 = shalt.err (!%p1112_p10)
}
 0x23d   : > { %s1206_s1 = smov 128   ;;  %s1207_s30 = smov 8   ;;  %vm573_vm1 = vcmask 130048  }
 0x23e   : > { %890 = dma.vmem_to_hbm [thread:$0]  (%p1639_p0), %s1519_s18, 256, %s1526_s12, %s584_s7, %s1206_s1, %s1206_s1, %s1207_s30  }
 0x23f   : > { %s365_s21 = scalar_lea.vmem [#allocation12], %s1477_s17  ;;  %s1563_s17 = scalar_lea.hbm %s1615_s5, %s829_s20 }
 0x240   : > { %s597_s11 = sshll.u32 %s365_s21, 4  ;;  %s579_s18 = scalar_lea.sflag [#allocation6], %s1474_s27  ;;  %s1556_s11 = int_to_ptr.vmem [resolvable:$true] %s597_s11 }
 0x241   : > { %s1116_s12 = scalar_lea.vmem %s1556_s11, 256  ;;  %s1208_s7 = smov [#allocation12]  }
 0x242   : > { %p1117_p11 = scmp.ne.s32.totalorder %s1556_s11, %s1116_s12  ;;  %s1120_s15 = sshll.u32 %s1208_s7, 4  ;;  %s1121_s15 = int_to_ptr.vmem [resolvable:$false] %s1120_s15 }
 0x243   : > { %s1122_s14 = scalar_lea.vmem %s1121_s15, 512  ;;  %p1123_p5 = scmp.lt.s32.totalorder %s1556_s11, %s1121_s15 }
 0x244   : > { %p1118_p4 = pnand %p1117_p11, %p1639_p0  ;;  %p1124_p1 = scmp.lt.s32.totalorder %s1122_s14, %s1116_s12 }
 0x246   : > { %p1119_p3 = pneg %p1118_p4  ;;  %p1125_p7 = por %p1124_p1, %p1123_p5 }
 0x248   : > { %p1126_p9 = pnand %p1125_p7, %p1119_p3 }
 0x303   : > { %v564_v44 = vpop.f32.mrb[0].mxu1 }
 0x304   : > { %v571_v45 = vmul.f32 0.5, %v564_v44  ;;  %v879_v46 = vpop.f32.mrb[1].mxu1 }
 0x305   : > { %v567_v47 = vpop.f32.mrb[2].mxu1 }
 0x306   : > { %574 = vst.msk [vmem:[%s365_s21] sm:$0xff] %vm573_vm1, %v571_v45  ;;  %v572_v48 = vmul.f32 0.5, %v567_v47  ;;  %v880_v49 = vpop.f32.mrb[3].mxu1 }
 0x308   : > { %575 = vst.msk [vmem:[%s365_s21 + $0x8] sm:$0xff] %vm573_vm1, %v572_v48 }
 0x309   : > { %1129 = shalt.err (!%p1126_p9)
}
 0x30a   : > { %s1130_s0 = scalar_lea.hbm %s1563_s17, 256  ;;  %s1134_s19 = scalar_lea.hbm %s1615_s5, 512 }
 0x30b   : > { %p1131_p12 = scmp.ne.s32.totalorder %s1563_s17, %s1130_s0  ;;  %p1135_p13 = scmp.lt.u32.totalorder %s1563_s17, %s1615_s5 }
 0x30c   : > { %p1136_p8 = scmp.lt.u32.totalorder %s1134_s19, %s1130_s0  ;;  %p1138_p11 = scmp.lt.u32.totalorder %s1130_s0, %s1563_s17 }
 0x30d   : > { %p1132_p2 = pnand %p1131_p12, %p1639_p0 }
 0x30e   : > { %p1137_p10 = por %p1136_p8, %p1135_p13 }
 0x30f   : > { %p1133_p6 = pneg %p1132_p2 }
 0x310   : > { %p1139_p4 = por %p1138_p11, %p1137_p10 }
 0x312   : > { %p1140_p3 = pnand %p1139_p4, %p1133_p6 }
 0x314   : > { %1143 = shalt.err (!%p1140_p3)
}
 0x315   : > { %889 = dma.vmem_to_hbm [thread:$0]  (%p1639_p0), %s1556_s11, 256, %s1563_s17, %s579_s18, %s1206_s1, %s1206_s1, %s1207_s30  }
 0x316 PF: > { %s628_s29 = sand.u32 1, %s1182_s23   ;;  %p1640_p5 = scmp.ne.s32.totalorder %s1628_s10, 0 }
 0x317   : > { %p1641_p1 = scmp.ge.s32.totalorder %s1194_s26, 2  ;;  %s629_s21 = scalar_lea.sflag [#allocation6], %s628_s29 }
 0x319   : > { %p907_p7 = pnand %p1641_p1, %p1640_p5 }
 0x31b   : > { %1173 = dma.done.wait (!%p907_p7), %s629_s21, 256  }
 0x31c   : > { %1175 = vsyncadd (!%p907_p7), %s629_s21, 4294967040  ;;  %s638_s9 = scalar_lea.sflag [#allocation14], %s628_s29 }
 0x31d   : > { %1177 = dma.done.wait (!%p907_p7), %s638_s9, 256  }
 0x31e   : > { %1179 = vsyncadd (!%p907_p7), %s638_s9, 4294967040  ;;  %s1642_s27 = sld [smem:[#allocation20_spill]]  ;;  %p30_p0 = scmp.ge.s32.totalorder %s1272_s28, 4  }
 0x31f   : > { %s1643_s23 = smov %s1186_s24  ;;  %s1644_s24 = smov %s1190_s25 }
 0x320   : > { %s1646_s26 = smov %s1272_s28  ;;  %32 = sbr.rel (!%p30_p0) target bundleno = 15 (0xf), region = 136 }
 0x324   : > { %s1645_s25 = smov %s1642_s27 }
 0x327   :  { %643 = vsyncpa [#allocation5], 1 }
 0x328   :  { %645 = vsyncpa [#allocation5 + $0x1], 1 }
 0x329   :  { %646 = vsyncpa [#allocation8], 1 }
 0x32a   :  { %648 = vsyncpa [#allocation8 + $0x1], 1 }
 0x32b   :  { %649 = vsyncpa [#allocation11], 1 }
 0x32c   :  { %651 = vsyncpa [#allocation11 + $0x1], 1 }
 0x32d   :  { %652 = vsyncpa [#allocation6], 1 }
 0x32e   :  { %654 = vsyncpa [#allocation6 + $0x1], 1 }
 0x32f   :  { %655 = vsyncpa [#allocation14], 1 }
 0x330   :  { %657 = vsyncpa [#allocation14 + $0x1], 1 }

</bundles_post_ra>
